<compile_context>
chip_gen: v5e
topology: v5e:2x2
jax: 0.10.0
libtpu: 0.0.40
codegen_flags: <defaults>
</compile_context>

<pallas_src>
import math

import jax
import jax.numpy as jnp
from jax import lax
from jax.experimental import pallas as pl
from jax.experimental.pallas import tpu as pltpu

_TOK_TILE_MAX = 256        # tokens per grid step
_VOCAB_INNER = 512         # vocab rows per one-hot matmul chunk (resident path)
_GATHER_DEPTH = 8          # outstanding row DMAs in the gather path


def _round_up(x: int, m: int) -> int:
    return ((x + m - 1) // m) * m


def _vmem_capacity_bytes() -> int:
    try:
        return int(pltpu.get_tpu_info().vmem_capacity_bytes)
    except Exception:
        return 64 << 20    # conservative fallback (v7x per-TensorCore VMEM)


# --------------------------------------------------------------------------
# Path 1: manual DMA row gather (any dtype, any vocab size).
# --------------------------------------------------------------------------
def _make_gather_kernel(tile: int, scale: float, depth: int):
    def kernel(ids_ref, tbl_hbm, out_ref, sems):
        base = pl.program_id(0) * tile

        def start_row(r, slot):
            tok = ids_ref[base + r]                       # SMEM scalar read
            pltpu.make_async_copy(tbl_hbm.at[tok], out_ref.at[r],
                                  sems.at[slot]).start()

        def wait_slot(slot):
            # Same-shaped descriptor; only the semaphore / byte count matter.
            pltpu.make_async_copy(tbl_hbm.at[0], out_ref.at[0],
                                  sems.at[slot]).wait()

        # Prime the ring.
        for r in range(depth):
            start_row(r, r)

        # Steady state: recycle the oldest slot, then issue the next row.
        @pl.loop(depth, tile)
        def _(r):
            slot = r % depth
            wait_slot(slot)
            start_row(r, slot)

        # Drain remaining copies.
        for s in range(depth):
            wait_slot(s)

        out_ref[...] = (out_ref[...].astype(jnp.float32) * scale
                        ).astype(out_ref.dtype)

    return kernel


def _gather_call(ids_flat, tbl, *, tile, n_pad, emb, scale, out_dtype,
                 vmem_limit):
    depth = min(_GATHER_DEPTH, tile)
    return pl.pallas_call(
        _make_gather_kernel(tile, scale, depth),
        out_shape=jax.ShapeDtypeStruct((n_pad, emb), out_dtype),
        grid_spec=pltpu.PrefetchScalarGridSpec(
            num_scalar_prefetch=1,                      # ids -> SMEM
            grid=(n_pad // tile,),
            in_specs=[pl.BlockSpec(memory_space=pl.ANY)],   # table stays in HBM
            out_specs=pl.BlockSpec((tile, emb), lambda i, ids: (i, 0)),
            scratch_shapes=[pltpu.SemaphoreType.DMA((depth,))],
        ),
        compiler_params=pltpu.CompilerParams(
            dimension_semantics=("parallel",),
            vmem_limit_bytes=vmem_limit,
        ),
    )(ids_flat, tbl)


# --------------------------------------------------------------------------
# Path 2: resident one-hot MXU matmul (bf16 tables that fit in VMEM).
# --------------------------------------------------------------------------
def _make_resident_kernel(tile: int, inner: int, n_inner: int, scale: float):
    def kernel(ids_ref, tbl_ref, out_ref):
        ids = ids_ref[...]                                        # (tile, 1)
        # Hoisted once; per-chunk offset applied on the small ids side.
        iota = lax.broadcasted_iota(jnp.int32, (tile, inner), 1)
        acc = None
        for c in range(n_inner):                                  # unrolled
            base = c * inner
            one_hot = ((ids - base) == iota).astype(tbl_ref.dtype)
            part = jnp.dot(one_hot, tbl_ref[base:base + inner, :],
                           preferred_element_type=jnp.float32)
            acc = part if acc is None else acc + part
        out_ref[...] = (acc * scale).astype(out_ref.dtype)        # single store

    return kernel


def _resident_call(ids2d, tbl, *, tile, inner, n_inner, v_pad, emb, n_pad,
                   scale, out_dtype, vmem_limit, single_buffer_table):
    tbl_kw = {"pipeline_mode": pl.Buffered(1)} if single_buffer_table else {}
    return pl.pallas_call(
        _make_resident_kernel(tile, inner, n_inner, scale),
        out_shape=jax.ShapeDtypeStruct((n_pad, emb), out_dtype),
        grid_spec=pltpu.PrefetchScalarGridSpec(
            num_scalar_prefetch=0,
            grid=(n_pad // tile,),
            in_specs=[
                pl.BlockSpec((tile, 1), lambda i: (i, 0)),             # ids
                pl.BlockSpec((v_pad, emb), lambda i: (0, 0), **tbl_kw),  # table
            ],
            out_specs=pl.BlockSpec((tile, emb), lambda i: (i, 0)),
        ),
        compiler_params=pltpu.CompilerParams(
            dimension_semantics=("parallel",),
            vmem_limit_bytes=vmem_limit,
        ),
    )(ids2d, tbl)


# --------------------------------------------------------------------------
# Wrapper (== TokenEmbedding.forward: embedding(tokens.long()) * sqrt(emb)).
# --------------------------------------------------------------------------
def token_embedding(tokens: jax.Array, emb_table: jax.Array) -> jax.Array:
    vocab, emb = emb_table.shape
    scale = float(math.sqrt(emb))
    out_dtype = emb_table.dtype
    itemsize = jnp.dtype(out_dtype).itemsize

    flat = jnp.clip(tokens.reshape(-1).astype(jnp.int32), 0, vocab - 1)
    n_tok = int(flat.shape[0])

    vmem_cap = _vmem_capacity_bytes()
    resident_budget = vmem_cap // 4           # ~16 MiB v7x, ~32 MiB v5e/v6e
    vmem_floor = min(32 << 20, vmem_cap // 2)

    # Token tiling: multiple of 8 (dense sublane stores) and >=2 tiles when
    # possible so "parallel" shards across v7x's two TensorCores.
    tile = min(_TOK_TILE_MAX, max(8, _round_up((n_tok + 1) // 2, 8)))
    n_pad = _round_up(n_tok, tile)
    ids = jnp.pad(flat, (0, n_pad - n_tok))

    inner = min(_VOCAB_INNER, _round_up(vocab, 128))
    v_pad = _round_up(vocab, inner)
    table_bytes = v_pad * emb * itemsize
    use_resident_matmul = (out_dtype == jnp.bfloat16
                           and table_bytes <= resident_budget)

    if use_resident_matmul:
        n_inner = v_pad // inner
        tbl = emb_table
        if v_pad != vocab:
            tbl = jnp.pad(emb_table, ((0, v_pad - vocab), (0, 0)))
        needed = (2 * table_bytes                    # table (worst-case 2 bufs)
                  + 2 * tile * emb * itemsize        # output blocks
                  + 2 * tile * 128 * 4               # ids blocks (lane padded)
                  + tile * emb * 4                   # f32 accumulator
                  + 2 * tile * inner * itemsize      # one-hot temporaries
                  + (2 << 20))                       # slack
        vmem_limit = int(max(needed, vmem_floor))    # never below requirement
        kwargs = dict(tile=tile, inner=inner, n_inner=n_inner, v_pad=v_pad,
                      emb=emb, n_pad=n_pad, scale=scale, out_dtype=out_dtype,
                      vmem_limit=vmem_limit)
        ids2d = ids.reshape(n_pad, 1)
        try:
            out_flat = _resident_call(ids2d, tbl, single_buffer_table=True,
                                      **kwargs)
        except Exception:
            # pipeline_mode=pl.Buffered(1) unsupported -> default buffering.
            out_flat = _resident_call(ids2d, tbl, single_buffer_table=False,
                                      **kwargs)
    else:
        # DMA row gather: reads only ~n_tok*emb*itemsize bytes, exact for any
        # dtype, no MXU work.
        needed = 2 * tile * emb * itemsize + (1 << 20)
        vmem_limit = int(max(needed, vmem_floor))
        out_flat = _gather_call(ids, emb_table, tile=tile, n_pad=n_pad,
                                emb=emb, scale=scale, out_dtype=out_dtype,
                                vmem_limit=vmem_limit)

    return out_flat[:n_tok].reshape(tokens.shape + (emb,))


if __name__ == "__main__":
    key = jax.random.PRNGKey(0)

    def check(vocab, emb, tok_shape, k, dtype=jnp.float32, tol=1e-5):
        k_emb, k_tok = jax.random.split(k)
        table = jax.random.normal(k_emb, (vocab, emb),
                                  dtype=jnp.float32).astype(dtype)
        tokens = jax.random.randint(k_tok, tok_shape, 0, vocab,
                                    dtype=jnp.int32)
        out = jax.block_until_ready(token_embedding(tokens, table))
        ref = (jnp.take(table, tokens, axis=0).astype(jnp.float32)
               * math.sqrt(emb)).astype(dtype)
        assert out.shape == tok_shape + (emb,), out.shape
        diff = float(jnp.max(jnp.abs(out.astype(jnp.float32)
                                     - ref.astype(jnp.float32))))
        assert diff <= tol, diff

    k0, k1, k2, k3 = jax.random.split(key, 4)
    # Small case matching the PyTorch module's typical (seq, batch) layout.
    check(vocab=64, emb=128, tok_shape=(8, 2), k=k0)
    # fp32 table -> DMA row-gather path, multiple token tiles.
    check(vocab=3000, emb=128, tok_shape=(160, 8), k=k1)
    # Large fp32 table -> gather reads only the needed rows (no table stream).
    check(vocab=20000, emb=128, tok_shape=(96, 4), k=k2)
    # bf16 resident table -> one-hot MXU matmul path (single-buffered table).
    check(vocab=1000, emb=128, tok_shape=(64, 4), k=k3,
          dtype=jnp.bfloat16, tol=0.5)

    print("KERNEL_OK")
</pallas_src>

<mosaic_0001>
module attributes {stable_mosaic.version = 11 : i64} {
  func.func @kernel(%arg0: i32, %arg1: memref<16xi32, #tpu.memory_space<smem>>, %arg2: memref<64x128xf32, #tpu.memory_space<any>>, %arg3: memref<8x128xf32, #tpu.memory_space<vmem>>, %arg4: memref<8x!tpu.dma_semaphore, #tpu.memory_space<semaphore_mem>>) attributes {dimension_semantics = [#tpu.dimension_semantics<parallel>], iteration_bounds = array<i64: 2>, scalar_prefetch = 1 : i64, scratch_operands = 1 : i64, tpu.core_type = #tpu.core_type<tc>, window_params = [{}, {transform_indices = @transform_1, window_bounds = array<i64: 8, 128>}]} {
    %c8_i32 = arith.constant 8 : i32
    %0 = arith.muli %arg0, %c8_i32 : i32
    %c0_i32 = arith.constant 0 : i32
    %1 = arith.addi %0, %c0_i32 : i32
    %2 = arith.index_cast %1 : i32 to index
    %3 = memref.load %arg1[%2] : memref<16xi32, #tpu.memory_space<smem>>
    %c0_i32_0 = arith.constant 0 : i32
    %c0_i32_1 = arith.constant 0 : i32
    %c0_i32_2 = arith.constant 0 : i32
    %4 = tpu.memref_slice %arg2[%3, %c0_i32_2] : memref<64x128xf32, #tpu.memory_space<any>> -> memref<1x128xf32, #tpu.memory_space<any>>
    %5 = tpu.memref_squeeze %4 : memref<1x128xf32, #tpu.memory_space<any>> -> memref<128xf32, #tpu.memory_space<any>>
    %c0_i32_3 = arith.constant 0 : i32
    %6 = tpu.memref_slice %arg3[%c0_i32_0, %c0_i32_3] : memref<8x128xf32, #tpu.memory_space<vmem>> -> memref<1x128xf32, #tpu.memory_space<vmem>>
    %7 = tpu.memref_squeeze %6 : memref<1x128xf32, #tpu.memory_space<vmem>> -> memref<128xf32, #tpu.memory_space<vmem>>
    %8 = tpu.memref_slice %arg4[%c0_i32_1] : memref<8x!tpu.dma_semaphore, #tpu.memory_space<semaphore_mem>> -> memref<1x!tpu.dma_semaphore, #tpu.memory_space<semaphore_mem>>
    %9 = tpu.memref_squeeze %8 : memref<1x!tpu.dma_semaphore, #tpu.memory_space<semaphore_mem>> -> memref<!tpu.dma_semaphore, #tpu.memory_space<semaphore_mem>>
    tpu.enqueue_dma source(%5 : memref<128xf32, #tpu.memory_space<any>>) target(%7 : memref<128xf32, #tpu.memory_space<vmem>>) target_semaphore(%9 : memref<!tpu.dma_semaphore, #tpu.memory_space<semaphore_mem>>)
    %c1_i32 = arith.constant 1 : i32
    %10 = arith.addi %0, %c1_i32 : i32
    %11 = arith.index_cast %10 : i32 to index
    %12 = memref.load %arg1[%11] : memref<16xi32, #tpu.memory_space<smem>>
    %c1_i32_4 = arith.constant 1 : i32
    %c1_i32_5 = arith.constant 1 : i32
    %c0_i32_6 = arith.constant 0 : i32
    %13 = tpu.memref_slice %arg2[%12, %c0_i32_6] : memref<64x128xf32, #tpu.memory_space<any>> -> memref<1x128xf32, #tpu.memory_space<any>>
    %14 = tpu.memref_squeeze %13 : memref<1x128xf32, #tpu.memory_space<any>> -> memref<128xf32, #tpu.memory_space<any>>
    %c0_i32_7 = arith.constant 0 : i32
    %15 = tpu.memref_slice %arg3[%c1_i32_4, %c0_i32_7] : memref<8x128xf32, #tpu.memory_space<vmem>> -> memref<1x128xf32, #tpu.memory_space<vmem>>
    %16 = tpu.memref_squeeze %15 : memref<1x128xf32, #tpu.memory_space<vmem>> -> memref<128xf32, #tpu.memory_space<vmem>>
    %17 = tpu.memref_slice %arg4[%c1_i32_5] : memref<8x!tpu.dma_semaphore, #tpu.memory_space<semaphore_mem>> -> memref<1x!tpu.dma_semaphore, #tpu.memory_space<semaphore_mem>>
    %18 = tpu.memref_squeeze %17 : memref<1x!tpu.dma_semaphore, #tpu.memory_space<semaphore_mem>> -> memref<!tpu.dma_semaphore, #tpu.memory_space<semaphore_mem>>
    tpu.enqueue_dma source(%14 : memref<128xf32, #tpu.memory_space<any>>) target(%16 : memref<128xf32, #tpu.memory_space<vmem>>) target_semaphore(%18 : memref<!tpu.dma_semaphore, #tpu.memory_space<semaphore_mem>>)
    %c2_i32 = arith.constant 2 : i32
    %19 = arith.addi %0, %c2_i32 : i32
    %20 = arith.index_cast %19 : i32 to index
    %21 = memref.load %arg1[%20] : memref<16xi32, #tpu.memory_space<smem>>
    %c2_i32_8 = arith.constant 2 : i32
    %c2_i32_9 = arith.constant 2 : i32
    %c0_i32_10 = arith.constant 0 : i32
    %22 = tpu.memref_slice %arg2[%21, %c0_i32_10] : memref<64x128xf32, #tpu.memory_space<any>> -> memref<1x128xf32, #tpu.memory_space<any>>
    %23 = tpu.memref_squeeze %22 : memref<1x128xf32, #tpu.memory_space<any>> -> memref<128xf32, #tpu.memory_space<any>>
    %c0_i32_11 = arith.constant 0 : i32
    %24 = tpu.memref_slice %arg3[%c2_i32_8, %c0_i32_11] : memref<8x128xf32, #tpu.memory_space<vmem>> -> memref<1x128xf32, #tpu.memory_space<vmem>>
    %25 = tpu.memref_squeeze %24 : memref<1x128xf32, #tpu.memory_space<vmem>> -> memref<128xf32, #tpu.memory_space<vmem>>
    %26 = tpu.memref_slice %arg4[%c2_i32_9] : memref<8x!tpu.dma_semaphore, #tpu.memory_space<semaphore_mem>> -> memref<1x!tpu.dma_semaphore, #tpu.memory_space<semaphore_mem>>
    %27 = tpu.memref_squeeze %26 : memref<1x!tpu.dma_semaphore, #tpu.memory_space<semaphore_mem>> -> memref<!tpu.dma_semaphore, #tpu.memory_space<semaphore_mem>>
    tpu.enqueue_dma source(%23 : memref<128xf32, #tpu.memory_space<any>>) target(%25 : memref<128xf32, #tpu.memory_space<vmem>>) target_semaphore(%27 : memref<!tpu.dma_semaphore, #tpu.memory_space<semaphore_mem>>)
    %c3_i32 = arith.constant 3 : i32
    %28 = arith.addi %0, %c3_i32 : i32
    %29 = arith.index_cast %28 : i32 to index
    %30 = memref.load %arg1[%29] : memref<16xi32, #tpu.memory_space<smem>>
    %c3_i32_12 = arith.constant 3 : i32
    %c3_i32_13 = arith.constant 3 : i32
    %c0_i32_14 = arith.constant 0 : i32
    %31 = tpu.memref_slice %arg2[%30, %c0_i32_14] : memref<64x128xf32, #tpu.memory_space<any>> -> memref<1x128xf32, #tpu.memory_space<any>>
    %32 = tpu.memref_squeeze %31 : memref<1x128xf32, #tpu.memory_space<any>> -> memref<128xf32, #tpu.memory_space<any>>
    %c0_i32_15 = arith.constant 0 : i32
    %33 = tpu.memref_slice %arg3[%c3_i32_12, %c0_i32_15] : memref<8x128xf32, #tpu.memory_space<vmem>> -> memref<1x128xf32, #tpu.memory_space<vmem>>
    %34 = tpu.memref_squeeze %33 : memref<1x128xf32, #tpu.memory_space<vmem>> -> memref<128xf32, #tpu.memory_space<vmem>>
    %35 = tpu.memref_slice %arg4[%c3_i32_13] : memref<8x!tpu.dma_semaphore, #tpu.memory_space<semaphore_mem>> -> memref<1x!tpu.dma_semaphore, #tpu.memory_space<semaphore_mem>>
    %36 = tpu.memref_squeeze %35 : memref<1x!tpu.dma_semaphore, #tpu.memory_space<semaphore_mem>> -> memref<!tpu.dma_semaphore, #tpu.memory_space<semaphore_mem>>
    tpu.enqueue_dma source(%32 : memref<128xf32, #tpu.memory_space<any>>) target(%34 : memref<128xf32, #tpu.memory_space<vmem>>) target_semaphore(%36 : memref<!tpu.dma_semaphore, #tpu.memory_space<semaphore_mem>>)
    %c4_i32 = arith.constant 4 : i32
    %37 = arith.addi %0, %c4_i32 : i32
    %38 = arith.index_cast %37 : i32 to index
    %39 = memref.load %arg1[%38] : memref<16xi32, #tpu.memory_space<smem>>
    %c4_i32_16 = arith.constant 4 : i32
    %c4_i32_17 = arith.constant 4 : i32
    %c0_i32_18 = arith.constant 0 : i32
    %40 = tpu.memref_slice %arg2[%39, %c0_i32_18] : memref<64x128xf32, #tpu.memory_space<any>> -> memref<1x128xf32, #tpu.memory_space<any>>
    %41 = tpu.memref_squeeze %40 : memref<1x128xf32, #tpu.memory_space<any>> -> memref<128xf32, #tpu.memory_space<any>>
    %c0_i32_19 = arith.constant 0 : i32
    %42 = tpu.memref_slice %arg3[%c4_i32_16, %c0_i32_19] : memref<8x128xf32, #tpu.memory_space<vmem>> -> memref<1x128xf32, #tpu.memory_space<vmem>>
    %43 = tpu.memref_squeeze %42 : memref<1x128xf32, #tpu.memory_space<vmem>> -> memref<128xf32, #tpu.memory_space<vmem>>
    %44 = tpu.memref_slice %arg4[%c4_i32_17] : memref<8x!tpu.dma_semaphore, #tpu.memory_space<semaphore_mem>> -> memref<1x!tpu.dma_semaphore, #tpu.memory_space<semaphore_mem>>
    %45 = tpu.memref_squeeze %44 : memref<1x!tpu.dma_semaphore, #tpu.memory_space<semaphore_mem>> -> memref<!tpu.dma_semaphore, #tpu.memory_space<semaphore_mem>>
    tpu.enqueue_dma source(%41 : memref<128xf32, #tpu.memory_space<any>>) target(%43 : memref<128xf32, #tpu.memory_space<vmem>>) target_semaphore(%45 : memref<!tpu.dma_semaphore, #tpu.memory_space<semaphore_mem>>)
    %c5_i32 = arith.constant 5 : i32
    %46 = arith.addi %0, %c5_i32 : i32
    %47 = arith.index_cast %46 : i32 to index
    %48 = memref.load %arg1[%47] : memref<16xi32, #tpu.memory_space<smem>>
    %c5_i32_20 = arith.constant 5 : i32
    %c5_i32_21 = arith.constant 5 : i32
    %c0_i32_22 = arith.constant 0 : i32
    %49 = tpu.memref_slice %arg2[%48, %c0_i32_22] : memref<64x128xf32, #tpu.memory_space<any>> -> memref<1x128xf32, #tpu.memory_space<any>>
    %50 = tpu.memref_squeeze %49 : memref<1x128xf32, #tpu.memory_space<any>> -> memref<128xf32, #tpu.memory_space<any>>
    %c0_i32_23 = arith.constant 0 : i32
    %51 = tpu.memref_slice %arg3[%c5_i32_20, %c0_i32_23] : memref<8x128xf32, #tpu.memory_space<vmem>> -> memref<1x128xf32, #tpu.memory_space<vmem>>
    %52 = tpu.memref_squeeze %51 : memref<1x128xf32, #tpu.memory_space<vmem>> -> memref<128xf32, #tpu.memory_space<vmem>>
    %53 = tpu.memref_slice %arg4[%c5_i32_21] : memref<8x!tpu.dma_semaphore, #tpu.memory_space<semaphore_mem>> -> memref<1x!tpu.dma_semaphore, #tpu.memory_space<semaphore_mem>>
    %54 = tpu.memref_squeeze %53 : memref<1x!tpu.dma_semaphore, #tpu.memory_space<semaphore_mem>> -> memref<!tpu.dma_semaphore, #tpu.memory_space<semaphore_mem>>
    tpu.enqueue_dma source(%50 : memref<128xf32, #tpu.memory_space<any>>) target(%52 : memref<128xf32, #tpu.memory_space<vmem>>) target_semaphore(%54 : memref<!tpu.dma_semaphore, #tpu.memory_space<semaphore_mem>>)
    %c6_i32 = arith.constant 6 : i32
    %55 = arith.addi %0, %c6_i32 : i32
    %56 = arith.index_cast %55 : i32 to index
    %57 = memref.load %arg1[%56] : memref<16xi32, #tpu.memory_space<smem>>
    %c6_i32_24 = arith.constant 6 : i32
    %c6_i32_25 = arith.constant 6 : i32
    %c0_i32_26 = arith.constant 0 : i32
    %58 = tpu.memref_slice %arg2[%57, %c0_i32_26] : memref<64x128xf32, #tpu.memory_space<any>> -> memref<1x128xf32, #tpu.memory_space<any>>
    %59 = tpu.memref_squeeze %58 : memref<1x128xf32, #tpu.memory_space<any>> -> memref<128xf32, #tpu.memory_space<any>>
    %c0_i32_27 = arith.constant 0 : i32
    %60 = tpu.memref_slice %arg3[%c6_i32_24, %c0_i32_27] : memref<8x128xf32, #tpu.memory_space<vmem>> -> memref<1x128xf32, #tpu.memory_space<vmem>>
    %61 = tpu.memref_squeeze %60 : memref<1x128xf32, #tpu.memory_space<vmem>> -> memref<128xf32, #tpu.memory_space<vmem>>
    %62 = tpu.memref_slice %arg4[%c6_i32_25] : memref<8x!tpu.dma_semaphore, #tpu.memory_space<semaphore_mem>> -> memref<1x!tpu.dma_semaphore, #tpu.memory_space<semaphore_mem>>
    %63 = tpu.memref_squeeze %62 : memref<1x!tpu.dma_semaphore, #tpu.memory_space<semaphore_mem>> -> memref<!tpu.dma_semaphore, #tpu.memory_space<semaphore_mem>>
    tpu.enqueue_dma source(%59 : memref<128xf32, #tpu.memory_space<any>>) target(%61 : memref<128xf32, #tpu.memory_space<vmem>>) target_semaphore(%63 : memref<!tpu.dma_semaphore, #tpu.memory_space<semaphore_mem>>)
    %c7_i32 = arith.constant 7 : i32
    %64 = arith.addi %0, %c7_i32 : i32
    %65 = arith.index_cast %64 : i32 to index
    %66 = memref.load %arg1[%65] : memref<16xi32, #tpu.memory_space<smem>>
    %c7_i32_28 = arith.constant 7 : i32
    %c7_i32_29 = arith.constant 7 : i32
    %c0_i32_30 = arith.constant 0 : i32
    %67 = tpu.memref_slice %arg2[%66, %c0_i32_30] : memref<64x128xf32, #tpu.memory_space<any>> -> memref<1x128xf32, #tpu.memory_space<any>>
    %68 = tpu.memref_squeeze %67 : memref<1x128xf32, #tpu.memory_space<any>> -> memref<128xf32, #tpu.memory_space<any>>
    %c0_i32_31 = arith.constant 0 : i32
    %69 = tpu.memref_slice %arg3[%c7_i32_28, %c0_i32_31] : memref<8x128xf32, #tpu.memory_space<vmem>> -> memref<1x128xf32, #tpu.memory_space<vmem>>
    %70 = tpu.memref_squeeze %69 : memref<1x128xf32, #tpu.memory_space<vmem>> -> memref<128xf32, #tpu.memory_space<vmem>>
    %71 = tpu.memref_slice %arg4[%c7_i32_29] : memref<8x!tpu.dma_semaphore, #tpu.memory_space<semaphore_mem>> -> memref<1x!tpu.dma_semaphore, #tpu.memory_space<semaphore_mem>>
    %72 = tpu.memref_squeeze %71 : memref<1x!tpu.dma_semaphore, #tpu.memory_space<semaphore_mem>> -> memref<!tpu.dma_semaphore, #tpu.memory_space<semaphore_mem>>
    tpu.enqueue_dma source(%68 : memref<128xf32, #tpu.memory_space<any>>) target(%70 : memref<128xf32, #tpu.memory_space<vmem>>) target_semaphore(%72 : memref<!tpu.dma_semaphore, #tpu.memory_space<semaphore_mem>>)
    %c0_i32_32 = arith.constant 0 : i32
    %c0_i32_33 = arith.constant 0 : i32
    %73 = arith.addi %c0_i32_32, %c0_i32_33 : i32
    %c1_i32_34 = arith.constant 1 : i32
    scf.for %arg5 = %c0_i32_32 to %73 step %c1_i32_34  : i32 {
      %c1_i32_79 = arith.constant 1 : i32
      %126 = arith.muli %arg5, %c1_i32_79 : i32
      %c8_i32_80 = arith.constant 8 : i32
      %127 = arith.addi %c8_i32_80, %126 : i32
      %c8_i32_81 = arith.constant 8 : i32
      %c0_i32_82 = arith.constant 0 : i32
      %128 = arith.cmpi eq, %c8_i32_81, %c0_i32_82 : i32
      %c1_i32_83 = arith.constant 1 : i32
      %129 = arith.select %128, %c1_i32_83, %c8_i32_81 : i32
      %130 = arith.remsi %127, %129 : i32
      %c0_i32_84 = arith.constant 0 : i32
      %131 = arith.cmpi ne, %130, %c0_i32_84 : i32
      %c0_i32_85 = arith.constant 0 : i32
      %132 = arith.cmpi slt, %130, %c0_i32_85 : i32
      %c0_i32_86 = arith.constant 0 : i32
      %133 = arith.cmpi slt, %129, %c0_i32_86 : i32
      %134 = arith.xori %132, %133 : i1
      %135 = arith.andi %134, %131 : i1
      %136 = arith.addi %130, %129 : i32
      %137 = arith.select %135, %136, %130 : i32
      %c0_i32_87 = arith.constant 0 : i32
      %c0_i32_88 = arith.constant 0 : i32
      %c0_i32_89 = arith.constant 0 : i32
      %138 = tpu.memref_slice %arg2[%c0_i32_87, %c0_i32_89] : memref<64x128xf32, #tpu.memory_space<any>> -> memref<1x128xf32, #tpu.memory_space<any>>
      %139 = tpu.memref_squeeze %138 : memref<1x128xf32, #tpu.memory_space<any>> -> memref<128xf32, #tpu.memory_space<any>>
      %c0_i32_90 = arith.constant 0 : i32
      %140 = tpu.memref_slice %arg3[%c0_i32_88, %c0_i32_90] : memref<8x128xf32, #tpu.memory_space<vmem>> -> memref<1x128xf32, #tpu.memory_space<vmem>>
      %141 = tpu.memref_squeeze %140 : memref<1x128xf32, #tpu.memory_space<vmem>> -> memref<128xf32, #tpu.memory_space<vmem>>
      %142 = tpu.memref_slice %arg4[%137] : memref<8x!tpu.dma_semaphore, #tpu.memory_space<semaphore_mem>> -> memref<1x!tpu.dma_semaphore, #tpu.memory_space<semaphore_mem>>
      %143 = tpu.memref_squeeze %142 : memref<1x!tpu.dma_semaphore, #tpu.memory_space<semaphore_mem>> -> memref<!tpu.dma_semaphore, #tpu.memory_space<semaphore_mem>>
      tpu.wait_dma2 semaphore(%143 : memref<!tpu.dma_semaphore, #tpu.memory_space<semaphore_mem>>) src(%139 : memref<128xf32, #tpu.memory_space<any>>) dst(%141 : memref<128xf32, #tpu.memory_space<vmem>>)
      %144 = arith.addi %0, %127 : i32
      %145 = arith.index_cast %144 : i32 to index
      %146 = memref.load %arg1[%145] : memref<16xi32, #tpu.memory_space<smem>>
      %c0_i32_91 = arith.constant 0 : i32
      %147 = tpu.memref_slice %arg2[%146, %c0_i32_91] : memref<64x128xf32, #tpu.memory_space<any>> -> memref<1x128xf32, #tpu.memory_space<any>>
      %148 = tpu.memref_squeeze %147 : memref<1x128xf32, #tpu.memory_space<any>> -> memref<128xf32, #tpu.memory_space<any>>
      %c0_i32_92 = arith.constant 0 : i32
      %149 = tpu.memref_slice %arg3[%127, %c0_i32_92] : memref<8x128xf32, #tpu.memory_space<vmem>> -> memref<1x128xf32, #tpu.memory_space<vmem>>
      %150 = tpu.memref_squeeze %149 : memref<1x128xf32, #tpu.memory_space<vmem>> -> memref<128xf32, #tpu.memory_space<vmem>>
      %151 = tpu.memref_slice %arg4[%137] : memref<8x!tpu.dma_semaphore, #tpu.memory_space<semaphore_mem>> -> memref<1x!tpu.dma_semaphore, #tpu.memory_space<semaphore_mem>>
      %152 = tpu.memref_squeeze %151 : memref<1x!tpu.dma_semaphore, #tpu.memory_space<semaphore_mem>> -> memref<!tpu.dma_semaphore, #tpu.memory_space<semaphore_mem>>
      tpu.enqueue_dma source(%148 : memref<128xf32, #tpu.memory_space<any>>) target(%150 : memref<128xf32, #tpu.memory_space<vmem>>) target_semaphore(%152 : memref<!tpu.dma_semaphore, #tpu.memory_space<semaphore_mem>>)
    }
    %c0_i32_35 = arith.constant 0 : i32
    %c0_i32_36 = arith.constant 0 : i32
    %c0_i32_37 = arith.constant 0 : i32
    %c0_i32_38 = arith.constant 0 : i32
    %c0_i32_39 = arith.constant 0 : i32
    %74 = tpu.memref_slice %arg2[%c0_i32_36, %c0_i32_39] : memref<64x128xf32, #tpu.memory_space<any>> -> memref<1x128xf32, #tpu.memory_space<any>>
    %75 = tpu.memref_squeeze %74 : memref<1x128xf32, #tpu.memory_space<any>> -> memref<128xf32, #tpu.memory_space<any>>
    %c0_i32_40 = arith.constant 0 : i32
    %76 = tpu.memref_slice %arg3[%c0_i32_37, %c0_i32_40] : memref<8x128xf32, #tpu.memory_space<vmem>> -> memref<1x128xf32, #tpu.memory_space<vmem>>
    %77 = tpu.memref_squeeze %76 : memref<1x128xf32, #tpu.memory_space<vmem>> -> memref<128xf32, #tpu.memory_space<vmem>>
    %78 = tpu.memref_slice %arg4[%c0_i32_38] : memref<8x!tpu.dma_semaphore, #tpu.memory_space<semaphore_mem>> -> memref<1x!tpu.dma_semaphore, #tpu.memory_space<semaphore_mem>>
    %79 = tpu.memref_squeeze %78 : memref<1x!tpu.dma_semaphore, #tpu.memory_space<semaphore_mem>> -> memref<!tpu.dma_semaphore, #tpu.memory_space<semaphore_mem>>
    tpu.wait_dma2 semaphore(%79 : memref<!tpu.dma_semaphore, #tpu.memory_space<semaphore_mem>>) src(%75 : memref<128xf32, #tpu.memory_space<any>>) dst(%77 : memref<128xf32, #tpu.memory_space<vmem>>)
    %c0_i32_41 = arith.constant 0 : i32
    %c0_i32_42 = arith.constant 0 : i32
    %c1_i32_43 = arith.constant 1 : i32
    %c0_i32_44 = arith.constant 0 : i32
    %80 = tpu.memref_slice %arg2[%c0_i32_41, %c0_i32_44] : memref<64x128xf32, #tpu.memory_space<any>> -> memref<1x128xf32, #tpu.memory_space<any>>
    %81 = tpu.memref_squeeze %80 : memref<1x128xf32, #tpu.memory_space<any>> -> memref<128xf32, #tpu.memory_space<any>>
    %c0_i32_45 = arith.constant 0 : i32
    %82 = tpu.memref_slice %arg3[%c0_i32_42, %c0_i32_45] : memref<8x128xf32, #tpu.memory_space<vmem>> -> memref<1x128xf32, #tpu.memory_space<vmem>>
    %83 = tpu.memref_squeeze %82 : memref<1x128xf32, #tpu.memory_space<vmem>> -> memref<128xf32, #tpu.memory_space<vmem>>
    %84 = tpu.memref_slice %arg4[%c1_i32_43] : memref<8x!tpu.dma_semaphore, #tpu.memory_space<semaphore_mem>> -> memref<1x!tpu.dma_semaphore, #tpu.memory_space<semaphore_mem>>
    %85 = tpu.memref_squeeze %84 : memref<1x!tpu.dma_semaphore, #tpu.memory_space<semaphore_mem>> -> memref<!tpu.dma_semaphore, #tpu.memory_space<semaphore_mem>>
    tpu.wait_dma2 semaphore(%85 : memref<!tpu.dma_semaphore, #tpu.memory_space<semaphore_mem>>) src(%81 : memref<128xf32, #tpu.memory_space<any>>) dst(%83 : memref<128xf32, #tpu.memory_space<vmem>>)
    %c0_i32_46 = arith.constant 0 : i32
    %c0_i32_47 = arith.constant 0 : i32
    %c2_i32_48 = arith.constant 2 : i32
    %c0_i32_49 = arith.constant 0 : i32
    %86 = tpu.memref_slice %arg2[%c0_i32_46, %c0_i32_49] : memref<64x128xf32, #tpu.memory_space<any>> -> memref<1x128xf32, #tpu.memory_space<any>>
    %87 = tpu.memref_squeeze %86 : memref<1x128xf32, #tpu.memory_space<any>> -> memref<128xf32, #tpu.memory_space<any>>
    %c0_i32_50 = arith.constant 0 : i32
    %88 = tpu.memref_slice %arg3[%c0_i32_47, %c0_i32_50] : memref<8x128xf32, #tpu.memory_space<vmem>> -> memref<1x128xf32, #tpu.memory_space<vmem>>
    %89 = tpu.memref_squeeze %88 : memref<1x128xf32, #tpu.memory_space<vmem>> -> memref<128xf32, #tpu.memory_space<vmem>>
    %90 = tpu.memref_slice %arg4[%c2_i32_48] : memref<8x!tpu.dma_semaphore, #tpu.memory_space<semaphore_mem>> -> memref<1x!tpu.dma_semaphore, #tpu.memory_space<semaphore_mem>>
    %91 = tpu.memref_squeeze %90 : memref<1x!tpu.dma_semaphore, #tpu.memory_space<semaphore_mem>> -> memref<!tpu.dma_semaphore, #tpu.memory_space<semaphore_mem>>
    tpu.wait_dma2 semaphore(%91 : memref<!tpu.dma_semaphore, #tpu.memory_space<semaphore_mem>>) src(%87 : memref<128xf32, #tpu.memory_space<any>>) dst(%89 : memref<128xf32, #tpu.memory_space<vmem>>)
    %c0_i32_51 = arith.constant 0 : i32
    %c0_i32_52 = arith.constant 0 : i32
    %c3_i32_53 = arith.constant 3 : i32
    %c0_i32_54 = arith.constant 0 : i32
    %92 = tpu.memref_slice %arg2[%c0_i32_51, %c0_i32_54] : memref<64x128xf32, #tpu.memory_space<any>> -> memref<1x128xf32, #tpu.memory_space<any>>
    %93 = tpu.memref_squeeze %92 : memref<1x128xf32, #tpu.memory_space<any>> -> memref<128xf32, #tpu.memory_space<any>>
    %c0_i32_55 = arith.constant 0 : i32
    %94 = tpu.memref_slice %arg3[%c0_i32_52, %c0_i32_55] : memref<8x128xf32, #tpu.memory_space<vmem>> -> memref<1x128xf32, #tpu.memory_space<vmem>>
    %95 = tpu.memref_squeeze %94 : memref<1x128xf32, #tpu.memory_space<vmem>> -> memref<128xf32, #tpu.memory_space<vmem>>
    %96 = tpu.memref_slice %arg4[%c3_i32_53] : memref<8x!tpu.dma_semaphore, #tpu.memory_space<semaphore_mem>> -> memref<1x!tpu.dma_semaphore, #tpu.memory_space<semaphore_mem>>
    %97 = tpu.memref_squeeze %96 : memref<1x!tpu.dma_semaphore, #tpu.memory_space<semaphore_mem>> -> memref<!tpu.dma_semaphore, #tpu.memory_space<semaphore_mem>>
    tpu.wait_dma2 semaphore(%97 : memref<!tpu.dma_semaphore, #tpu.memory_space<semaphore_mem>>) src(%93 : memref<128xf32, #tpu.memory_space<any>>) dst(%95 : memref<128xf32, #tpu.memory_space<vmem>>)
    %c0_i32_56 = arith.constant 0 : i32
    %c0_i32_57 = arith.constant 0 : i32
    %c4_i32_58 = arith.constant 4 : i32
    %c0_i32_59 = arith.constant 0 : i32
    %98 = tpu.memref_slice %arg2[%c0_i32_56, %c0_i32_59] : memref<64x128xf32, #tpu.memory_space<any>> -> memref<1x128xf32, #tpu.memory_space<any>>
    %99 = tpu.memref_squeeze %98 : memref<1x128xf32, #tpu.memory_space<any>> -> memref<128xf32, #tpu.memory_space<any>>
    %c0_i32_60 = arith.constant 0 : i32
    %100 = tpu.memref_slice %arg3[%c0_i32_57, %c0_i32_60] : memref<8x128xf32, #tpu.memory_space<vmem>> -> memref<1x128xf32, #tpu.memory_space<vmem>>
    %101 = tpu.memref_squeeze %100 : memref<1x128xf32, #tpu.memory_space<vmem>> -> memref<128xf32, #tpu.memory_space<vmem>>
    %102 = tpu.memref_slice %arg4[%c4_i32_58] : memref<8x!tpu.dma_semaphore, #tpu.memory_space<semaphore_mem>> -> memref<1x!tpu.dma_semaphore, #tpu.memory_space<semaphore_mem>>
    %103 = tpu.memref_squeeze %102 : memref<1x!tpu.dma_semaphore, #tpu.memory_space<semaphore_mem>> -> memref<!tpu.dma_semaphore, #tpu.memory_space<semaphore_mem>>
    tpu.wait_dma2 semaphore(%103 : memref<!tpu.dma_semaphore, #tpu.memory_space<semaphore_mem>>) src(%99 : memref<128xf32, #tpu.memory_space<any>>) dst(%101 : memref<128xf32, #tpu.memory_space<vmem>>)
    %c0_i32_61 = arith.constant 0 : i32
    %c0_i32_62 = arith.constant 0 : i32
    %c5_i32_63 = arith.constant 5 : i32
    %c0_i32_64 = arith.constant 0 : i32
    %104 = tpu.memref_slice %arg2[%c0_i32_61, %c0_i32_64] : memref<64x128xf32, #tpu.memory_space<any>> -> memref<1x128xf32, #tpu.memory_space<any>>
    %105 = tpu.memref_squeeze %104 : memref<1x128xf32, #tpu.memory_space<any>> -> memref<128xf32, #tpu.memory_space<any>>
    %c0_i32_65 = arith.constant 0 : i32
    %106 = tpu.memref_slice %arg3[%c0_i32_62, %c0_i32_65] : memref<8x128xf32, #tpu.memory_space<vmem>> -> memref<1x128xf32, #tpu.memory_space<vmem>>
    %107 = tpu.memref_squeeze %106 : memref<1x128xf32, #tpu.memory_space<vmem>> -> memref<128xf32, #tpu.memory_space<vmem>>
    %108 = tpu.memref_slice %arg4[%c5_i32_63] : memref<8x!tpu.dma_semaphore, #tpu.memory_space<semaphore_mem>> -> memref<1x!tpu.dma_semaphore, #tpu.memory_space<semaphore_mem>>
    %109 = tpu.memref_squeeze %108 : memref<1x!tpu.dma_semaphore, #tpu.memory_space<semaphore_mem>> -> memref<!tpu.dma_semaphore, #tpu.memory_space<semaphore_mem>>
    tpu.wait_dma2 semaphore(%109 : memref<!tpu.dma_semaphore, #tpu.memory_space<semaphore_mem>>) src(%105 : memref<128xf32, #tpu.memory_space<any>>) dst(%107 : memref<128xf32, #tpu.memory_space<vmem>>)
    %c0_i32_66 = arith.constant 0 : i32
    %c0_i32_67 = arith.constant 0 : i32
    %c6_i32_68 = arith.constant 6 : i32
    %c0_i32_69 = arith.constant 0 : i32
    %110 = tpu.memref_slice %arg2[%c0_i32_66, %c0_i32_69] : memref<64x128xf32, #tpu.memory_space<any>> -> memref<1x128xf32, #tpu.memory_space<any>>
    %111 = tpu.memref_squeeze %110 : memref<1x128xf32, #tpu.memory_space<any>> -> memref<128xf32, #tpu.memory_space<any>>
    %c0_i32_70 = arith.constant 0 : i32
    %112 = tpu.memref_slice %arg3[%c0_i32_67, %c0_i32_70] : memref<8x128xf32, #tpu.memory_space<vmem>> -> memref<1x128xf32, #tpu.memory_space<vmem>>
    %113 = tpu.memref_squeeze %112 : memref<1x128xf32, #tpu.memory_space<vmem>> -> memref<128xf32, #tpu.memory_space<vmem>>
    %114 = tpu.memref_slice %arg4[%c6_i32_68] : memref<8x!tpu.dma_semaphore, #tpu.memory_space<semaphore_mem>> -> memref<1x!tpu.dma_semaphore, #tpu.memory_space<semaphore_mem>>
    %115 = tpu.memref_squeeze %114 : memref<1x!tpu.dma_semaphore, #tpu.memory_space<semaphore_mem>> -> memref<!tpu.dma_semaphore, #tpu.memory_space<semaphore_mem>>
    tpu.wait_dma2 semaphore(%115 : memref<!tpu.dma_semaphore, #tpu.memory_space<semaphore_mem>>) src(%111 : memref<128xf32, #tpu.memory_space<any>>) dst(%113 : memref<128xf32, #tpu.memory_space<vmem>>)
    %c0_i32_71 = arith.constant 0 : i32
    %c0_i32_72 = arith.constant 0 : i32
    %c7_i32_73 = arith.constant 7 : i32
    %c0_i32_74 = arith.constant 0 : i32
    %116 = tpu.memref_slice %arg2[%c0_i32_71, %c0_i32_74] : memref<64x128xf32, #tpu.memory_space<any>> -> memref<1x128xf32, #tpu.memory_space<any>>
    %117 = tpu.memref_squeeze %116 : memref<1x128xf32, #tpu.memory_space<any>> -> memref<128xf32, #tpu.memory_space<any>>
    %c0_i32_75 = arith.constant 0 : i32
    %118 = tpu.memref_slice %arg3[%c0_i32_72, %c0_i32_75] : memref<8x128xf32, #tpu.memory_space<vmem>> -> memref<1x128xf32, #tpu.memory_space<vmem>>
    %119 = tpu.memref_squeeze %118 : memref<1x128xf32, #tpu.memory_space<vmem>> -> memref<128xf32, #tpu.memory_space<vmem>>
    %120 = tpu.memref_slice %arg4[%c7_i32_73] : memref<8x!tpu.dma_semaphore, #tpu.memory_space<semaphore_mem>> -> memref<1x!tpu.dma_semaphore, #tpu.memory_space<semaphore_mem>>
    %121 = tpu.memref_squeeze %120 : memref<1x!tpu.dma_semaphore, #tpu.memory_space<semaphore_mem>> -> memref<!tpu.dma_semaphore, #tpu.memory_space<semaphore_mem>>
    tpu.wait_dma2 semaphore(%121 : memref<!tpu.dma_semaphore, #tpu.memory_space<semaphore_mem>>) src(%117 : memref<128xf32, #tpu.memory_space<any>>) dst(%119 : memref<128xf32, #tpu.memory_space<vmem>>)
    %c0 = arith.constant 0 : index
    %c0_76 = arith.constant 0 : index
    %122 = vector.load %arg3[%c0, %c0_76] : memref<8x128xf32, #tpu.memory_space<vmem>>, vector<8x128xf32>
    %cst = arith.constant 11.3137083 : f32
    %123 = vector.broadcast %cst : f32 to vector<8x128xf32>
    %124 = arith.mulf %122, %123 : vector<8x128xf32>
    %c0_77 = arith.constant 0 : index
    %c0_78 = arith.constant 0 : index
    %125 = vector.load %arg3[%c0_77, %c0_78] : memref<8x128xf32, #tpu.memory_space<vmem>>, vector<8x128xf32>
    tpu.vector_store %arg3[%c0_77, %c0_78], %124 {strides = array<i32>} : memref<8x128xf32, #tpu.memory_space<vmem>>, vector<8x128xf32>,
    return
  }
  func.func @transform_1(%arg0: i32, %arg1: memref<16xi32, #tpu.memory_space<smem>>) -> (i32, i32) {
    %c0_i32 = arith.constant 0 : i32
    %c0_i32_0 = arith.constant 0 : i32
    return %arg0, %c0_i32 : i32, i32
  }
}

</mosaic_0001>

<bundles_post_ra>
// kernel: tpu_custom_call.1
= control target key start
LH: loop header
LB: loop body
LE: loop exit
PB: predicated region body
PF: predicated region fallthrough
CT: control target
= control target key end

     0   :  { %s666_s12 = smov [#allocation4]   ;;  %s868_s0 = inlined_call_operand.hbm [shape: s32[16], index: 0, kind: input, shape index: {}]   ;;  %s869_s1 = inlined_call_operand.hbm [shape: f32[64,128], index: 1, kind: input, shape index: {}]   ;;  %s870_s2 = inlined_call_operand.hbm [shape: f32[16,128], index: 2, kind: output, shape index: {}]  }
   0x1   :  { %s8_s11 = sshll.u32 %s868_s0, 4  ;;  %s9_s11 = int_to_ptr.hbm [resolvable:$true] %s8_s11 }
   0x2   :  { %11 = dma.hbm_to_smem %s9_s11, 16, %s666_s12, [#allocation3] }
   0x3   :  { %632 = dma.done.wait [#allocation3], 16 }
   0x4   :  { %633 = vsyncadd [#allocation3], 4294967280 }
   0x5   :  { %14 = sfence }
   0x6   :  { %15 = vsyncpa [#allocation6], 0 }
   0x7   :  { %17 = vsyncpa [#allocation6 + $0x1], 0  ;;  %s685_s13 = smov 0   ;;  %s687_s14 = smov 0  }
   0x8   :  { %s689_s15 = smov 0  }
   0x9 LB: > { %s339_s0 = sadd.s32 4294967295, %s664_s15   ;;  %s702_s16 = sadd.s32 1, %s664_s15   ;;  %s664_s15 = sphi %s689_s15, %s875_s15   ;;  %s660_s14 = sphi %s687_s14, %s874_s14   ;;  %s656_s13 = sphi %s685_s13, %s873_s13  }
   0xa   : > { %s26_s17 = ssub.s32 %s664_s15, %s702_s16  ;;  %s29_s18 = sadd.s32 1, %s660_s14 }
   0xb   : > { %p27_p0 = scmp.eq.s32.totalorder %s26_s17, 0  ;;  %p340_p1 = scmp.ne.s32.totalorder %s26_s17, 0 }
   0xc   : > { %p33_p2 = scmp.eq.s32.totalorder %s664_s15, 1  ;;  %p38_p3 = scmp.ne.s32.totalorder %s660_s14, %s656_s13 }
   0xd   : > { %s711_s19 = scalar_select %p27_p0, %s660_s14, %s29_s18  }
   0xe   : > { %p713_p4 = por %p340_p1, %p33_p2  ;;  %p39_p5 = scmp.eq.s32.totalorder %s339_s0, 1 }
   0xf   : > { %p341_p7 = scmp.ge.s32.totalorder %s664_s15, 2 }
  0x10   : > { %p717_p6 = por %p39_p5, %p38_p3  ;;  %s53_s22 = sand.u32 (!%p341_p7), 1, %s660_s14  }
  0x11   : > { %48 = sbr.rel (%p341_p7) target bundleno = 151 (0x97), region = 12  ;;  %s724_s23 = sshll.u32 (!%p341_p7), %s664_s15, 3 }
  0x12   : > { %s342_s24 = sshll.u32 (!%p341_p7), %s53_s22, 3  ;;  %s57_s25 = sld [smem:[#allocation4 + %s724_s23]] (!%p341_p7) }
  0x13   : > { %s72_s26 = sadd.s32 (!%p341_p7), 1, %s724_s23  ;;  %s730_s27 = scalar_lea.vmem (!%p341_p7), [#allocation5], %s342_s24 }
  0x14   : > { %s68_s28 = sshll.u32 (!%p341_p7), %s730_s27, 4  ;;  %s73_s29 = sld [smem:[#allocation4 + %s72_s26]] (!%p341_p7)  ;;  %s733_s28 = int_to_ptr.vmem [resolvable:$true] %s68_s28 }
  0x15   : > { %s75_s30 = scalar_lea.vmem (!%p341_p7), %s730_s27, 1 [#allocation5]  ;;  %s90_s4 = sadd.s32 (!%p341_p7), 2, %s724_s23 }
  0x16   : > { %s736_s3 = sshll.u32 %s75_s30, 4  ;;  %s740_s5 = sld [smem:[#allocation4 + %s90_s4]]  ;;  %s87_s3 = int_to_ptr.vmem [resolvable:$true] %s736_s3 }
  0x17   : > { %s93_s9 = scalar_lea.vmem %s730_s27, 2 [#allocation5]  ;;  %s754_s4 = scalar_lea.hbm %s869_s1, 64 }
  0x18   : > { %s58_s8 = scalar_lea.hbm %s869_s1, %s57_s25  ;;  %s746_s11 = sshll.u32 %s93_s9, 4  ;;  %s105_s11 = int_to_ptr.vmem [resolvable:$true] %s746_s11 }
  0x19   : > { %s66_s10 = sshll.u32 %s58_s8, 4  ;;  %s67_s10 = int_to_ptr.hbm [resolvable:$true] %s66_s10 }
  0x1a   : > { %s74_s17 = scalar_lea.hbm %s869_s1, %s73_s29  ;;  %s400_s18 = sshra.s32 %s67_s10, 4  ;;  %s401_s18 = int_to_ptr.hbm [resolvable:$true] %s400_s18 }
  0x1b   : > { %s402_s24 = scalar_lea.hbm %s401_s18, 1  ;;  %p405_p9 = scmp.lt.s32.totalorder %s401_s18, %s869_s1 }
  0x1c   : > { %p403_p8 = scmp.ne.s32.totalorder %s401_s18, %s402_s24  ;;  %p406_p10 = scmp.lt.s32.totalorder %s754_s4, %s402_s24 }
  0x1e   : > { %p407_p11 = por %p406_p10, %p405_p9 }
  0x20   : > { %p408_p12 = pnand %p407_p11, %p403_p8 }
  0x22   : > { %411 = shalt.err (!%p408_p12)  }
  0x23   : > { %71 = dma.hbm_to_vmem [thread:$0]  %s67_s10, 16, %s733_s28, [#allocation2] }
  0x24   : > { %s84_s29 = sshll.u32 %s74_s17, 4  ;;  %s92_s9 = scalar_lea.hbm %s869_s1, %s740_s5  ;;  %s85_s29 = int_to_ptr.hbm [resolvable:$true] %s84_s29 }
  0x25   : > { %s424_s12 = sshra.s32 %s85_s29, 4  ;;  %s425_s12 = int_to_ptr.hbm [resolvable:$true] %s424_s12 }
  0x26   : > { %s426_s0 = scalar_lea.hbm %s425_s12, 1  ;;  %p429_p0 = scmp.lt.s32.totalorder %s425_s12, %s869_s1 }
  0x27   : > { %p427_p13 = scmp.ne.s32.totalorder %s425_s12, %s426_s0  ;;  %p430_p1 = scmp.lt.s32.totalorder %s754_s4, %s426_s0 }
  0x29   : > { %p431_p2 = por %p430_p1, %p429_p0 }
  0x2b   : > { %p432_p3 = pnand %p431_p2, %p427_p13 }
  0x2d   : > { %435 = shalt.err (!%p432_p3)  }
  0x2e   : > { %89 = dma.hbm_to_vmem [thread:$0]  %s85_s29, 16, %s87_s3, [#allocation2 + $0x1] }
  0x2f   : > { %s102_s10 = sshll.u32 %s92_s9, 4  ;;  %s108_s17 = sadd.s32 3, %s724_s23  ;;  %s103_s10 = int_to_ptr.hbm [resolvable:$true] %s102_s10 }
  0x30   : > { %s109_s5 = sld [smem:[#allocation4 + %s108_s17]]  ;;  %s448_s26 = sshra.s32 %s103_s10, 4  ;;  %s449_s26 = int_to_ptr.hbm [resolvable:$true] %s448_s26 }
  0x31   : > { %s450_s30 = scalar_lea.hbm %s449_s26, 1  ;;  %p453_p7 = scmp.lt.s32.totalorder %s449_s26, %s869_s1 }
  0x32   : > { %p451_p5 = scmp.ne.s32.totalorder %s449_s26, %s450_s30  ;;  %p454_p8 = scmp.lt.s32.totalorder %s754_s4, %s450_s30 }
  0x34   : > { %p455_p9 = por %p454_p8, %p453_p7 }
  0x36   : > { %p456_p10 = pnand %p455_p9, %p451_p5 }
  0x38   : > { %459 = shalt.err (!%p456_p10)  }
  0x39   : > { %107 = dma.hbm_to_vmem [thread:$0]  %s103_s10, 16, %s105_s11, [#allocation2 + $0x2] }
  0x3a   : > { %s111_s3 = scalar_lea.vmem %s730_s27, 3 [#allocation5]  ;;  %s126_s29 = sadd.s32 4, %s724_s23 }
  0x3b   : > { %s122_s7 = sshll.u32 %s111_s3, 4  ;;  %s127_s8 = sld [smem:[#allocation4 + %s126_s29]]  ;;  %s123_s7 = int_to_ptr.vmem [resolvable:$true] %s122_s7 }
  0x3c   : > { %s129_s9 = scalar_lea.vmem %s730_s27, 4 [#allocation5]  ;;  %s144_s0 = sadd.s32 5, %s724_s23 }
  0x3d   : > { %s780_s12 = sshll.u32 %s129_s9, 4  ;;  %s110_s11 = scalar_lea.hbm %s869_s1, %s109_s5  ;;  %s141_s12 = int_to_ptr.vmem [resolvable:$true] %s780_s12 }
  0x3e   : > { %s120_s10 = sshll.u32 %s110_s11, 4  ;;  %s787_s17 = sld [smem:[#allocation4 + %s144_s0]]  ;;  %s121_s10 = int_to_ptr.hbm [resolvable:$true] %s120_s10 }
  0x3f   : > { %s147_s26 = scalar_lea.vmem %s730_s27, 5 [#allocation5]  ;;  %s472_s30 = sshra.s32 %s121_s10, 4  ;;  %s473_s30 = int_to_ptr.hbm [resolvable:$true] %s472_s30 }
  0x40   : > { %s474_s6 = scalar_lea.hbm %s473_s30, 1  ;;  %p477_p12 = scmp.lt.s32.totalorder %s473_s30, %s869_s1 }
  0x41   : > { %p475_p11 = scmp.ne.s32.totalorder %s473_s30, %s474_s6  ;;  %p478_p13 = scmp.lt.s32.totalorder %s754_s4, %s474_s6 }
  0x43   : > { %p479_p0 = por %p478_p13, %p477_p12 }
  0x45   : > { %p480_p1 = pnand %p479_p0, %p475_p11 }
  0x47   : > { %483 = shalt.err (!%p480_p1)  }
  0x48   : > { %125 = dma.hbm_to_vmem [thread:$0]  %s121_s10, 16, %s123_s7, [#allocation2 + $0x3] }
  0x49   : > { %s128_s9 = scalar_lea.hbm %s869_s1, %s127_s8  ;;  %s797_s0 = sshll.u32 %s147_s26, 4  ;;  %s159_s0 = int_to_ptr.vmem [resolvable:$true] %s797_s0 }
  0x4a   : > { %s138_s18 = sshll.u32 %s128_s9, 4  ;;  %s162_s24 = sadd.s32 6, %s724_s23  ;;  %s139_s18 = int_to_ptr.hbm [resolvable:$true] %s138_s18 }
  0x4b   : > { %s496_s11 = sshra.s32 %s139_s18, 4  ;;  %s497_s11 = int_to_ptr.hbm [resolvable:$true] %s496_s11 }
  0x4c   : > { %s498_s30 = scalar_lea.hbm %s497_s11, 1  ;;  %p501_p3 = scmp.lt.s32.totalorder %s497_s11, %s869_s1 }
  0x4d   : > { %p499_p2 = scmp.ne.s32.totalorder %s497_s11, %s498_s30  ;;  %p502_p5 = scmp.lt.s32.totalorder %s754_s4, %s498_s30 }
  0x4f   : > { %p503_p7 = por %p502_p5, %p501_p3 }
  0x51   : > { %p504_p8 = pnand %p503_p7, %p499_p2 }
  0x53   : > { %507 = shalt.err (!%p504_p8)  }
  0x54   : > { %143 = dma.hbm_to_vmem [thread:$0]  %s139_s18, 16, %s141_s12, [#allocation2 + $0x4] }
  0x55   : > { %s146_s10 = scalar_lea.hbm %s869_s1, %s787_s17  ;;  %s163_s26 = sld [smem:[#allocation4 + %s162_s24]] }
  0x56   : > { %s156_s3 = sshll.u32 %s146_s10, 4  ;;  %s165_s5 = scalar_lea.vmem %s730_s27, 6 [#allocation5]  ;;  %s157_s3 = int_to_ptr.hbm [resolvable:$true] %s156_s3 }
  0x57   : > { %s812_s29 = sshll.u32 %s165_s5, 4  ;;  %s520_s9 = sshra.s32 %s157_s3, 4  ;;  %s521_s9 = int_to_ptr.hbm [resolvable:$true] %s520_s9  ;;  %s177_s29 = int_to_ptr.vmem [resolvable:$true] %s812_s29 }
  0x58   : > { %s522_s11 = scalar_lea.hbm %s521_s9, 1  ;;  %p525_p10 = scmp.lt.s32.totalorder %s521_s9, %s869_s1 }
  0x59   : > { %p523_p9 = scmp.ne.s32.totalorder %s521_s9, %s522_s11  ;;  %p526_p11 = scmp.lt.s32.totalorder %s754_s4, %s522_s11 }
  0x5b   : > { %p527_p12 = por %p526_p11, %p525_p10 }
  0x5d   : > { %p528_p13 = pnand %p527_p12, %p523_p9 }
  0x5f   : > { %531 = shalt.err (!%p528_p13)  }
  0x60   : > { %161 = dma.hbm_to_vmem [thread:$0]  %s157_s3, 16, %s159_s0, [#allocation2 + $0x5] }
  0x61   : > { %s180_s12 = sadd.s32 7, %s724_s23  ;;  %s183_s18 = scalar_lea.vmem %s730_s27, 7 [#allocation5] }
  0x62   : > { %s181_s17 = sld [smem:[#allocation4 + %s180_s12]]  ;;  %s164_s7 = scalar_lea.hbm %s869_s1, %s163_s26 }
  0x63   : > { %s174_s8 = sshll.u32 %s164_s7, 4  ;;  %s194_s10 = sshll.u32 %s183_s18, 4  ;;  %s175_s8 = int_to_ptr.hbm [resolvable:$true] %s174_s8  ;;  %s195_s10 = int_to_ptr.vmem [resolvable:$true] %s194_s10 }
  0x64   : > { %s544_s5 = sshra.s32 %s175_s8, 4  ;;  %s545_s5 = int_to_ptr.hbm [resolvable:$true] %s544_s5 }
  0x65   : > { %s546_s9 = scalar_lea.hbm %s545_s5, 1  ;;  %p549_p1 = scmp.lt.s32.totalorder %s545_s5, %s869_s1 }
  0x66   : > { %p547_p0 = scmp.ne.s32.totalorder %s545_s5, %s546_s9  ;;  %p550_p2 = scmp.lt.s32.totalorder %s754_s4, %s546_s9 }
  0x68   : > { %p551_p3 = por %p550_p2, %p549_p1 }
  0x6a   : > { %p552_p5 = pnand %p551_p3, %p547_p0 }
  0x6c   : > { %555 = shalt.err (!%p552_p5)  }
  0x6d   : > { %179 = dma.hbm_to_vmem [thread:$0]  %s175_s8, 16, %s177_s29, [#allocation2 + $0x6] }
  0x6e   : > { %s182_s26 = scalar_lea.hbm %s869_s1, %s181_s17 }
  0x6f   : > { %s192_s6 = sshll.u32 %s182_s26, 4  ;;  %s193_s6 = int_to_ptr.hbm [resolvable:$true] %s192_s6 }
  0x70   : > { %s568_s12 = sshra.s32 %s193_s6, 4  ;;  %s569_s12 = int_to_ptr.hbm [resolvable:$true] %s568_s12 }
  0x71   : > { %s570_s18 = scalar_lea.hbm %s569_s12, 1  ;;  %p573_p8 = scmp.lt.s32.totalorder %s569_s12, %s869_s1 }
  0x72   : > { %p571_p7 = scmp.ne.s32.totalorder %s569_s12, %s570_s18  ;;  %p574_p9 = scmp.lt.s32.totalorder %s754_s4, %s570_s18 }
  0x74   : > { %p575_p10 = por %p574_p9, %p573_p8 }
  0x76   : > { %p576_p11 = pnand %p575_p10, %p571_p7 }
  0x78   : > { %579 = shalt.err (!%p576_p11)  }
  0x79   : > { %197 = dma.hbm_to_vmem [thread:$0]  %s193_s6, 16, %s195_s10, [#allocation2 + $0x7] }
  0x7a   : > { %634 = dma.done.wait [#allocation2], 16 }
  0x7b   : > { %635 = vsyncadd [#allocation2], 4294967280 }
  0x7c   : > { %636 = dma.done.wait [#allocation2 + $0x1], 16 }
  0x7d   : > { %637 = vsyncadd [#allocation2 + $0x1], 4294967280 }
  0x7e   : > { %638 = dma.done.wait [#allocation2 + $0x2], 16 }
  0x7f   : > { %639 = vsyncadd [#allocation2 + $0x2], 4294967280 }
  0x80   : > { %640 = dma.done.wait [#allocation2 + $0x3], 16 }
  0x81   : > { %641 = vsyncadd [#allocation2 + $0x3], 4294967280 }
  0x82   : > { %642 = dma.done.wait [#allocation2 + $0x4], 16 }
  0x83   : > { %643 = vsyncadd [#allocation2 + $0x4], 4294967280 }
  0x84   : > { %644 = dma.done.wait [#allocation2 + $0x5], 16 }
  0x85   : > { %645 = vsyncadd [#allocation2 + $0x5], 4294967280 }
  0x86   : > { %646 = dma.done.wait [#allocation2 + $0x6], 16 }
  0x87   : > { %647 = vsyncadd [#allocation2 + $0x6], 4294967280 }
  0x88   : > { %648 = dma.done.wait [#allocation2 + $0x7], 16 }
  0x89   : > { %649 = vsyncadd [#allocation2 + $0x7], 4294967280  ;;  %s228_s17 = scalar_lea.hbm %s870_s2, %s724_s23  ;;  %v214_v0 = vld [vmem:[%s730_s27] sm:$0xff]  ;;  %s218_s8 = scalar_lea.sflag [#allocation6], %s53_s22 }
  0x8a   : > { %s232_s7 = sshll.u32 %s228_s17, 4  ;;  %v215_v1 = vmul.f32 11.313708, %v214_v0  ;;  %s612_s3 = scalar_lea.hbm %s870_s2, 16  ;;  %s233_s7 = int_to_ptr.hbm [resolvable:$true] %s232_s7 }
  0x8b   : > { %s606_s10 = sshra.s32 %s233_s7, 4  ;;  %s607_s10 = int_to_ptr.hbm [resolvable:$true] %s606_s10 }
  0x8c   : > { %216 = vst [vmem:[%s730_s27] sm:$0xff] %v215_v1  ;;  %s608_s5 = scalar_lea.hbm %s607_s10, 8  ;;  %p613_p1 = scmp.lt.s32.totalorder %s607_s10, %s870_s2 }
  0x8d   : > { %p609_p12 = scmp.ne.s32.totalorder %s607_s10, %s608_s5  ;;  %p614_p2 = scmp.lt.s32.totalorder %s612_s3, %s608_s5 }
  0x8f   : > { %p610_p13 = pnand %p609_p12, %p713_p4  ;;  %p615_p3 = por %p614_p2, %p613_p1 }
  0x91   : > { %p611_p0 = pneg %p610_p13 }
  0x93   : > { %p616_p5 = pnand %p615_p3, %p611_p0 }
  0x95   : > { %619 = shalt.err (!%p616_p5)
}
  0x96   : > { %356 = dma.vmem_to_hbm [thread:$0]  (%p713_p4), %s733_s28, 128, %s233_s7, %s218_s8  }
  0x97 PF: > { %p362_p7 = scmp.ge.s32.totalorder %s664_s15, 1  ;;  %s244_s22 = sand.u32 1, %s656_s13  }
  0x98   : > { %s245_s27 = scalar_lea.sflag [#allocation6], %s244_s22 }
  0x99   : > { %p359_p8 = pnand %p362_p7, %p717_p6 }
  0x9b   : > { %p360_p9 = pneg %p359_p8 }
  0x9d   : > { %651 = dma.done.wait (%p360_p9), %s245_s27, 128  }
  0x9e   : > { %653 = vsyncadd (%p360_p9), %s245_s27, 4294967168  ;;  %p20_p10 = scmp.ge.s32.totalorder %s702_s16, 3   ;;  %s873_s13 = smov %s660_s14 }
  0x9f   : > { %s874_s14 = smov %s711_s19  ;;  %s875_s15 = smov %s702_s16 }
  0xa0   :  { %22 = sbr.rel (!%p20_p10) target bundleno = 9 (0x9), region = 105 }
  0xa5   :  { %251 = vsyncpa [#allocation6], 1 }
  0xa6   :  { %253 = vsyncpa [#allocation6 + $0x1], 1 }
  0xa7   :  { %254 = vsyncmov [#allocation2] }
  0xaa   :  { %s255_s15 = vpop.sfrf %254 }
  0xab   :  { %p348_p4 = scmp.ne.s32.totalorder %s255_s15, 0 }
  0xad   :  { %259 = shalt.err (%p348_p4)  }
  0xae   :  { %261 = vsyncmov [#allocation2 + $0x1] }
  0xb1   :  { %s262_s20 = vpop.sfrf %261 }
  0xb2   :  { %p349_p6 = scmp.ne.s32.totalorder %s262_s20, 0 }
  0xb4   :  { %266 = shalt.err (%p349_p6)  }
  0xb5   :  { %268 = vsyncmov [#allocation2 + $0x2] }
  0xb8   :  { %s269_s21 = vpop.sfrf %268 }
  0xb9   :  { %p350_p11 = scmp.ne.s32.totalorder %s269_s21, 0 }
  0xbb   :  { %273 = shalt.err (%p350_p11)  }
  0xbc   :  { %275 = vsyncmov [#allocation2 + $0x3] }
  0xbf   :  { %s276_s28 = vpop.sfrf %275 }
  0xc0   :  { %p351_p12 = scmp.ne.s32.totalorder %s276_s28, 0 }
  0xc2   :  { %280 = shalt.err (%p351_p12)  }
  0xc3   :  { %282 = vsyncmov [#allocation2 + $0x4] }
  0xc6   :  { %s283_s16 = vpop.sfrf %282 }
  0xc7   :  { %p352_p13 = scmp.ne.s32.totalorder %s283_s16, 0 }
  0xc9   :  { %287 = shalt.err (%p352_p13)  }
  0xca   :  { %289 = vsyncmov [#allocation2 + $0x5] }
  0xcd   :  { %s290_s1 = vpop.sfrf %289 }
  0xce   :  { %p353_p0 = scmp.ne.s32.totalorder %s290_s1, 0 }
  0xd0   :  { %294 = shalt.err (%p353_p0)  }
  0xd1   :  { %296 = vsyncmov [#allocation2 + $0x6] }
  0xd4   :  { %s297_s2 = vpop.sfrf %296 }
  0xd5   :  { %p354_p1 = scmp.ne.s32.totalorder %s297_s2, 0 }
  0xd7   :  { %301 = shalt.err (%p354_p1)  }
  0xd8   :  { %303 = vsyncmov [#allocation2 + $0x7] }
  0xdb   :  { %s304_s13 = vpop.sfrf %303 }
  0xdc   :  { %p355_p2 = scmp.ne.s32.totalorder %s304_s13, 0 }
  0xde   :  { %308 = shalt.err (%p355_p2)  }

</bundles_post_ra>
